<compile_context>
chip_gen: v6e
topology: v6e:2x2x1
jax: 0.10.0
libtpu: 0.0.40
codegen_flags: <defaults>
</compile_context>

<pallas_src>
import functools
import math

import jax
import jax.numpy as jnp
from jax.experimental import pallas as pl
from jax.experimental.pallas import tpu as pltpu

_EPS = 1e-5
_LANE = 128
_SUB = 16            # bf16 sublane-packed tile height
_BM_CAP = 1024       # rows per grid step at large batch (VMEM << limits)


def _round_up(x, m):
    return ((x + m - 1) // m) * m


def _emb2feature_kernel(x_ref, w1_ref, b1_ref, w2_ref, b2_ref, out_ref, *,
                        h_true):
    """x:(bm,L) bf16  w1:(L,Hp) bf16  b1:(1,Hp) f32  w2:(Hp,Fp) bf16
    b2:(1,Fp) f32  out:(bm,Fp) f32.

    Hp/Fp are 128-lane padded; pad columns of w1/b1 and pad rows of w2 are
    zero, so plain lane sums divided by the true hidden size give correct LN
    statistics, and the (-mu * rsqrt) residue left in pad lanes is annihilated
    by the zero rows of w2."""
    # Linear 1 (MXU, f32 accumulate).
    h = jnp.dot(x_ref[...], w1_ref[...],
                preferred_element_type=jnp.float32) + b1_ref[...]

    # LayerNorm stats over the true hidden dim, in f32 (VPU/EUP path).
    inv_h = 1.0 / h_true
    mu = jnp.sum(h, axis=-1, keepdims=True) * inv_h
    ex2 = jnp.sum(h * h, axis=-1, keepdims=True) * inv_h
    var = jnp.maximum(ex2 - mu * mu, 0.0)
    hn = (h - mu) * jax.lax.rsqrt(var + _EPS)

    # Linear 2 (gamma folded into w2, beta folded into b2) ->
    # single dense, lane-aligned store of the whole (bm, Fp) output tile.
    out_ref[...] = jnp.dot(hn.astype(w2_ref.dtype), w2_ref[...],
                           preferred_element_type=jnp.float32) + b2_ref[...]


def make_emb2feature(params):
    """Pre-pack parameters once and return a jitted forward:
    x (B, latent_dim) f32 -> (B, featuredim) f32."""
    fc1_w, fc1_b = params["fc1_w"], params["fc1_b"]      # (H, L), (H,)
    ln_g, ln_b = params["ln_g"], params["ln_b"]          # (H,),   (H,)
    fc2_w, fc2_b = params["fc2_w"], params["fc2_b"]      # (F, H), (F,)

    H, L = fc1_w.shape
    F = fc2_w.shape[0]
    H_pad = _round_up(H, _LANE)
    F_pad = _round_up(F, _LANE)

    # ---- one-time parameter prep (hoisted out of the per-call hot path) ----
    w1 = jnp.pad(fc1_w.T, ((0, 0), (0, H_pad - H))).astype(jnp.bfloat16)
    b1 = jnp.pad(fc1_b, (0, H_pad - H)).reshape(1, H_pad).astype(jnp.float32)
    # Fold LN affine into fc2:  ((d*r)*g + b) W2^T + c
    #                         = (d*r) (g[:,None]*W2^T) + (b W2^T + c)
    w2_f = fc2_w.T * ln_g[:, None]                                   # (H, F)
    b2_f = fc2_b + jnp.dot(ln_b, fc2_w.T,
                           precision=jax.lax.Precision.HIGHEST)      # (F,)
    w2 = jnp.pad(w2_f, ((0, H_pad - H), (0, F_pad - F))).astype(jnp.bfloat16)
    b2 = jnp.pad(b2_f, (0, F_pad - F)).reshape(1, F_pad).astype(jnp.float32)

    kernel = functools.partial(_emb2feature_kernel, h_true=float(H))

    @jax.jit
    def forward(x):
        B = x.shape[0]
        # Pad batch only to the 16-row bf16 sublane tile (NOT to bm).
        B_pad = _round_up(max(B, _SUB), _SUB)
        # Batch tile: whole batch when small; >=2 parallel steps (<= _BM_CAP
        # rows each) at larger batch so v7x can shard across both TCs.
        if B_pad <= 128:
            bm = B_pad
        elif B_pad <= 2 * _BM_CAP:
            bm = _round_up(pl.cdiv(B_pad, 2), _SUB)
        else:
            bm = _BM_CAP
        grid = (pl.cdiv(B_pad, bm),)

        x_p = jnp.pad(x, ((0, B_pad - B), (0, 0))) if B_pad != B else x
        x_p = x_p.astype(jnp.bfloat16)          # halve x DMA bytes

        out = pl.pallas_call(
            kernel,
            out_shape=jax.ShapeDtypeStruct((B_pad, F_pad), jnp.float32),
            grid=grid,
            in_specs=[
                pl.BlockSpec((bm, L), lambda i: (i, 0)),          # x tile
                pl.BlockSpec((L, H_pad), lambda i: (0, 0)),       # fc1 weight
                pl.BlockSpec((1, H_pad), lambda i: (0, 0)),       # fc1 bias
                pl.BlockSpec((H_pad, F_pad), lambda i: (0, 0)),   # folded fc2 W
                pl.BlockSpec((1, F_pad), lambda i: (0, 0)),       # folded fc2 b
            ],
            out_specs=pl.BlockSpec((bm, F_pad), lambda i: (i, 0)),
            compiler_params=pltpu.CompilerParams(
                dimension_semantics=("parallel",)),               # v7x: 2 TCs
        )(x_p, w1, b1, w2, b2)

        return out[:B, :F]

    return forward


def reference_forward(x, p):
    """Pure-JAX reference with exact PyTorch semantics (HIGHEST precision)."""
    hi = jax.lax.Precision.HIGHEST
    h = jnp.dot(x, p["fc1_w"].T, precision=hi) + p["fc1_b"]
    mu = h.mean(-1, keepdims=True)
    var = ((h - mu) ** 2).mean(-1, keepdims=True)
    h = (h - mu) / jnp.sqrt(var + _EPS) * p["ln_g"] + p["ln_b"]
    return jnp.dot(h, p["fc2_w"].T, precision=hi) + p["fc2_b"]


if __name__ == "__main__":
    B, LATENT, FEATURE = 2, 32, 64
    HIDDEN = LATENT * 2

    keys = iter(jax.random.split(jax.random.PRNGKey(0), 16))

    def nrm(shape, scale):
        return scale * jax.random.normal(next(keys), shape, jnp.float32)

    x = nrm((B, LATENT), 1.0)
    params = {
        "fc1_w": nrm((HIDDEN, LATENT), 1.0 / math.sqrt(LATENT)),
        "fc1_b": nrm((HIDDEN,), 0.02),
        "ln_g": 1.0 + nrm((HIDDEN,), 0.1),
        "ln_b": nrm((HIDDEN,), 0.1),
        "fc2_w": nrm((FEATURE, HIDDEN), 1.0 / math.sqrt(HIDDEN)),
        "fc2_b": nrm((FEATURE,), 0.02),
    }

    fwd = make_emb2feature(params)

    out = jax.block_until_ready(fwd(x))
    ref = jax.block_until_ready(reference_forward(x, params))
    assert out.shape == (B, FEATURE), out.shape
    # Kernel uses the MXU's native bf16 path (default precision) vs a
    # HIGHEST-precision reference -> expect ~1e-2 scale max-abs deviation.
    err = float(jnp.max(jnp.abs(out - ref)))
    assert err < 2.5e-2, f"kernel/reference mismatch, max abs err = {err}"

    # Second check: an odd batch exercises the sublane-pad + row-slice path.
    x2 = nrm((13, LATENT), 1.0)
    out2 = jax.block_until_ready(fwd(x2))
    ref2 = reference_forward(x2, params)
    err2 = float(jnp.max(jnp.abs(out2 - ref2)))
    assert out2.shape == (13, FEATURE), out2.shape
    assert err2 < 2.5e-2, f"kernel/reference mismatch (B=13), max abs err = {err2}"

    print("KERNEL_OK")
</pallas_src>

<mosaic_0001>
module attributes {stable_mosaic.version = 11 : i64} {
  func.func @_emb2feature_kernel(%arg0: i32, %arg1: memref<16x32xbf16, #tpu.memory_space<vmem>>, %arg2: memref<32x128xbf16, #tpu.memory_space<vmem>>, %arg3: memref<1x128xf32, #tpu.memory_space<vmem>>, %arg4: memref<128x128xbf16, #tpu.memory_space<vmem>>, %arg5: memref<1x128xf32, #tpu.memory_space<vmem>>, %arg6: memref<16x128xf32, #tpu.memory_space<vmem>>) attributes {dimension_semantics = [#tpu.dimension_semantics<parallel>], iteration_bounds = array<i64: 1>, scalar_prefetch = 0 : i64, scratch_operands = 0 : i64, tpu.core_type = #tpu.core_type<tc>, window_params = [{transform_indices = @transform_0, window_bounds = array<i64: 16, 32>}, {pipeline_mode = #tpu.pipeline_mode<synchronous>, transform_indices = @transform_1, window_bounds = array<i64: 32, 128>}, {pipeline_mode = #tpu.pipeline_mode<synchronous>, transform_indices = @transform_2, window_bounds = array<i64: 1, 128>}, {pipeline_mode = #tpu.pipeline_mode<synchronous>, transform_indices = @transform_3, window_bounds = array<i64: 128, 128>}, {pipeline_mode = #tpu.pipeline_mode<synchronous>, transform_indices = @transform_4, window_bounds = array<i64: 1, 128>}, {transform_indices = @transform_5, window_bounds = array<i64: 16, 128>}]} {
    %c0 = arith.constant 0 : index
    %c0_0 = arith.constant 0 : index
    %0 = vector.load %arg1[%c0, %c0_0] : memref<16x32xbf16, #tpu.memory_space<vmem>>, vector<16x32xbf16>
    %c0_1 = arith.constant 0 : index
    %c0_2 = arith.constant 0 : index
    %1 = vector.load %arg2[%c0_1, %c0_2] : memref<32x128xbf16, #tpu.memory_space<vmem>>, vector<32x128xbf16>
    %cst = arith.constant dense<0.000000e+00> : vector<16x128xf32>
    %2 = tpu.matmul %0, %1, %cst {dimension_numbers = #tpu.dot_dimension_numbers<[1], [0], [0], [1], [0, 0, 1, 1], [], []>} : vector<16x32xbf16>, vector<32x128xbf16>, vector<16x128xf32> -> vector<16x128xf32>
    %c0_3 = arith.constant 0 : index
    %c0_4 = arith.constant 0 : index
    %3 = vector.load %arg3[%c0_3, %c0_4] : memref<1x128xf32, #tpu.memory_space<vmem>>, vector<1x128xf32>
    %4 = vector.broadcast %3 : vector<1x128xf32> to vector<16x128xf32>
    %5 = arith.addf %2, %4 : vector<16x128xf32>
    %cst_5 = arith.constant dense<0.000000e+00> : vector<16xf32>
    %6 = vector.multi_reduction <add>, %5, %cst_5 [1] : vector<16x128xf32> to vector<16xf32>
    %7 = vector.shape_cast %6 : vector<16xf32> to vector<16x1xf32>
    %cst_6 = arith.constant 1.562500e-02 : f32
    %8 = vector.broadcast %cst_6 : f32 to vector<16x1xf32>
    %9 = arith.mulf %7, %8 : vector<16x1xf32>
    %10 = arith.mulf %5, %5 : vector<16x128xf32>
    %cst_7 = arith.constant dense<0.000000e+00> : vector<16xf32>
    %11 = vector.multi_reduction <add>, %10, %cst_7 [1] : vector<16x128xf32> to vector<16xf32>
    %12 = vector.shape_cast %11 : vector<16xf32> to vector<16x1xf32>
    %cst_8 = arith.constant 1.562500e-02 : f32
    %13 = vector.broadcast %cst_8 : f32 to vector<16x1xf32>
    %14 = arith.mulf %12, %13 : vector<16x1xf32>
    %15 = arith.mulf %9, %9 : vector<16x1xf32>
    %16 = arith.subf %14, %15 : vector<16x1xf32>
    %cst_9 = arith.constant 0.000000e+00 : f32
    %17 = vector.broadcast %cst_9 : f32 to vector<16x1xf32>
    %18 = arith.maximumf %16, %17 : vector<16x1xf32>
    %19 = vector.broadcast %9 : vector<16x1xf32> to vector<16x128xf32>
    %20 = arith.subf %5, %19 : vector<16x128xf32>
    %cst_10 = arith.constant 9.99999974E-6 : f32
    %21 = vector.broadcast %cst_10 : f32 to vector<16x1xf32>
    %22 = arith.addf %18, %21 : vector<16x1xf32>
    %23 = math.rsqrt %22 : vector<16x1xf32>
    %24 = vector.broadcast %23 : vector<16x1xf32> to vector<16x128xf32>
    %25 = arith.mulf %20, %24 : vector<16x128xf32>
    %26 = arith.truncf %25 : vector<16x128xf32> to vector<16x128xbf16>
    %c0_11 = arith.constant 0 : index
    %c0_12 = arith.constant 0 : index
    %27 = vector.load %arg4[%c0_11, %c0_12] : memref<128x128xbf16, #tpu.memory_space<vmem>>, vector<128x128xbf16>
    %cst_13 = arith.constant dense<0.000000e+00> : vector<16x128xf32>
    %28 = tpu.matmul %26, %27, %cst_13 {dimension_numbers = #tpu.dot_dimension_numbers<[1], [0], [0], [1], [0, 0, 1, 1], [], []>} : vector<16x128xbf16>, vector<128x128xbf16>, vector<16x128xf32> -> vector<16x128xf32>
    %c0_14 = arith.constant 0 : index
    %c0_15 = arith.constant 0 : index
    %29 = vector.load %arg5[%c0_14, %c0_15] : memref<1x128xf32, #tpu.memory_space<vmem>>, vector<1x128xf32>
    %30 = vector.broadcast %29 : vector<1x128xf32> to vector<16x128xf32>
    %31 = arith.addf %28, %30 : vector<16x128xf32>
    %c0_16 = arith.constant 0 : index
    %c0_17 = arith.constant 0 : index
    %32 = vector.load %arg6[%c0_16, %c0_17] : memref<16x128xf32, #tpu.memory_space<vmem>>, vector<16x128xf32>
    tpu.vector_store %arg6[%c0_16, %c0_17], %31 {strides = array<i32>} : memref<16x128xf32, #tpu.memory_space<vmem>>, vector<16x128xf32>,
    return
  }
  func.func @transform_0(%arg0: i32) -> (i32, i32) {
    %c0_i32 = arith.constant 0 : i32
    %c0_i32_0 = arith.constant 0 : i32
    return %arg0, %c0_i32 : i32, i32
  }
  func.func @transform_1(%arg0: i32) -> (i32, i32) {
    %c0_i32 = arith.constant 0 : i32
    %c0_i32_0 = arith.constant 0 : i32
    %c0_i32_1 = arith.constant 0 : i32
    return %c0_i32, %c0_i32_0 : i32, i32
  }
  func.func @transform_2(%arg0: i32) -> (i32, i32) {
    %c0_i32 = arith.constant 0 : i32
    %c0_i32_0 = arith.constant 0 : i32
    %c0_i32_1 = arith.constant 0 : i32
    return %c0_i32, %c0_i32_0 : i32, i32
  }
  func.func @transform_3(%arg0: i32) -> (i32, i32) {
    %c0_i32 = arith.constant 0 : i32
    %c0_i32_0 = arith.constant 0 : i32
    %c0_i32_1 = arith.constant 0 : i32
    return %c0_i32, %c0_i32_0 : i32, i32
  }
  func.func @transform_4(%arg0: i32) -> (i32, i32) {
    %c0_i32 = arith.constant 0 : i32
    %c0_i32_0 = arith.constant 0 : i32
    %c0_i32_1 = arith.constant 0 : i32
    return %c0_i32, %c0_i32_0 : i32, i32
  }
  func.func @transform_5(%arg0: i32) -> (i32, i32) {
    %c0_i32 = arith.constant 0 : i32
    %c0_i32_0 = arith.constant 0 : i32
    return %arg0, %c0_i32 : i32, i32
  }
}

</mosaic_0001>

<bundles_post_ra>
// kernel: forward.1
= control target key start
LH: loop header
LB: loop body
LE: loop exit
PB: predicated region body
PF: predicated region fallthrough
CT: control target
= control target key end

     0   :  { %10 = vsyncpa [#allocation3], 0  ;;  %s449_s0 = inlined_call_operand.vmem [shape: bf16[16,32], index: 0, kind: input, shape index: {}]   ;;  %s450_s1 = inlined_call_operand.hbm [shape: bf16[32,128], index: 1, kind: input, shape index: {}]   ;;  %s451_s2 = inlined_call_operand.vmem [shape: f32[1,128], index: 2, kind: input, shape index: {}]   ;;  %s452_s3 = inlined_call_operand.hbm [shape: bf16[128,128], index: 3, kind: input, shape index: {}]   ;;  %s453_s4 = inlined_call_operand.vmem [shape: f32[1,128], index: 4, kind: input, shape index: {}]   ;;  %s454_s5 = inlined_call_operand.vmem [shape: f32[16,128], index: 5, kind: output, shape index: {}]  }
   0x1   :  { %11 = vsyncpa [#allocation5], 0  ;;  %s392_s18 = smov [#allocation2]  }
   0x2   :  { %s19_s19 = sshll.u32 %s392_s18, 4  ;;  %s20_s19 = int_to_ptr.vmem [resolvable:$true] %s19_s19 }
   0x3   :  { %s356_s20 = scalar_lea.vmem %s20_s19, 256  ;;  %p361_p1 = scmp.lt.s32.totalorder %s20_s19, %s20_s19 }
   0x4   :  { %p357_p0 = scmp.ne.s32.totalorder %s20_s19, %s356_s20  ;;  %p362_p2 = scmp.lt.s32.totalorder %s356_s20, %s356_s20 }
   0x6   :  { %p363_p3 = por %p362_p2, %p361_p1 }
   0x8   :  { %p364_p4 = pnand %p363_p3, %p357_p0 }
   0xa   :  { %367 = shalt.err (!%p364_p4)
}
   0xb   :  { %s393_s21 = smov 64   ;;  %s394_s22 = smov 4  }
   0xc   :  { %25 = dma.hbm_to_vmem [thread:$0]  %s450_s1, 256, %s20_s19, [#allocation3], %s393_s21, %s393_s21, %s394_s22  }
   0xd   :  { %s395_s25 = smov [#allocation4]  }
   0xe   :  { %s33_s26 = sshll.u32 %s395_s25, 4  ;;  %s34_s26 = int_to_ptr.vmem [resolvable:$true] %s33_s26 }
   0xf   :  { %s376_s27 = scalar_lea.vmem %s34_s26, 1024  ;;  %p381_p6 = scmp.lt.s32.totalorder %s34_s26, %s34_s26 }
  0x10   :  { %p377_p5 = scmp.ne.s32.totalorder %s34_s26, %s376_s27  ;;  %p382_p7 = scmp.lt.s32.totalorder %s376_s27, %s376_s27 }
  0x12   :  { %p383_p8 = por %p382_p7, %p381_p6 }
  0x14   :  { %p384_p9 = pnand %p383_p8, %p377_p5 }
  0x16   :  { %387 = shalt.err (!%p384_p9)
}
  0x17   :  { %39 = dma.hbm_to_vmem [thread:$0]  %s452_s3, 1024, %s34_s26, [#allocation5], %s393_s21, %s393_s21, %s394_s22  }
  0x18   :  { %388 = dma.done.wait [#allocation3], 256  }
  0x19   :  { %389 = vsyncadd [#allocation3], 4294967040 }
  0x1a   :  { %390 = dma.done.wait [#allocation5], 1024  }
  0x1b   :  { %391 = vsyncadd [#allocation5], 4294966272  ;;  %v396_v0 = vmov 0.0   ;;  %vm397_vm0 = vmmov 0   ;;  %v333_v1 = vld [vmem:[#allocation2 + $0x8] sm:$0xff]   ;;  %v334_v2 = vld [vmem:[#allocation2] sm:$0xff]  }
  0x1c   :  { %299 = vmatprep.subr.bf16.mxu0 %v396_v0  ;;  %303 = vmatprep.mubr.msk.bf16.mxu0 %vm397_vm0, %v396_v0  ;;  %v335_v3 = vld [vmem:[%s449_s0] sm:$0xff]   ;;  %vm79_vm1 = vcmask 261120   ;;  %v336_v13 = vld [vmem:[#allocation4 + $0x38] sm:$0xff]   ;;  %v338_v15 = vld [vmem:[#allocation4 + $0x28] sm:$0xff]  }
  0x1d   :  { %307 = vmatprep.subr.bf16.mxu1 %v396_v0  ;;  %323 = vmatprep.mubr.msk.bf16.mxu1 %vm397_vm0, %v396_v0  ;;  %v273_v4 = vld [vmem:[%s451_s2] ss:$0 sm:$0xff]  ;;  %v339_v16 = vld [vmem:[#allocation4 + $0x20] sm:$0xff]   ;;  %v340_v17 = vld [vmem:[#allocation4 + $0x18] sm:$0xff]  }
  0x1e   :  { %300 = vmatpush3.bf16.msra.mxu0 %v333_v1  ;;  %308 = vmatpush3.bf16.msra.mxu1 %v336_v13  ;;  %v337_v14 = vld [vmem:[#allocation4 + $0x30] sm:$0xff]   ;;  %v342_v19 = vld [vmem:[#allocation4 + $0x8] sm:$0xff]   ;;  %v343_v20 = vld [vmem:[#allocation4] sm:$0xff]  }
  0x1f   :  { %301 = vmatprep.subr.bf16.mxu0 %v396_v0  ;;  %309 = vmatprep.subr.bf16.mxu1 %v396_v0  ;;  %v341_v18 = vld [vmem:[#allocation4 + $0x10] sm:$0xff]  }
  0x20   :  { %v278_v44 = vld [vmem:[%s453_s4] ss:$0 sm:$0xff] }
  0x22   :  { %302 = vmatpush3.bf16.msra.mxu0 %v334_v2  ;;  %310 = vmatpush3.bf16.msra.mxu1 %v337_v14 }
  0x23   :  { %311 = vmatprep.subr.bf16.mxu1 %v396_v0 }
  0x25   :  { %304 = vmatmul.mubr.msk.bf16.vlgmr.msra.gmra.mxu0 %vm79_vm1, %v335_v3 }
  0x26   :  { %312 = vmatpush3.bf16.msra.mxu1 %v338_v15 }
  0x27   :  { %313 = vmatprep.subr.bf16.mxu1 %v396_v0 }
  0x2a   :  { %314 = vmatpush3.bf16.msra.mxu1 %v339_v16 }
  0x2b   :  { %315 = vmatprep.subr.bf16.mxu1 %v396_v0 }
  0x2e   :  { %316 = vmatpush3.bf16.msra.mxu1 %v340_v17 }
  0x2f   :  { %317 = vmatprep.subr.bf16.mxu1 %v396_v0 }
  0x32   :  { %318 = vmatpush3.bf16.msra.mxu1 %v341_v18 }
  0x33   :  { %319 = vmatprep.subr.bf16.mxu1 %v396_v0 }
  0x36   :  { %320 = vmatpush3.bf16.msra.mxu1 %v342_v19 }
  0x37   :  { %321 = vmatprep.subr.bf16.mxu1 %v396_v0 }
  0x3a   :  { %322 = vmatpush3.bf16.msra.mxu1 %v343_v20 }
  0xe5   :  { %v117_v5 = vpop.f32.mrf.mxu0 }
  0xe6   :  { %v118_v6 = vadd.f32 %v273_v4, %v117_v5 }
  0xe7   :  { %v305_v7 = vpop.f32.mrf.mxu0 }
  0xe8   :  { %124 = vadd.xlane.f32.xlu0 %v118_v6  ;;  %v130_v8 = vmul.f32 %v118_v6, %v118_v6 }
  0xe9   :  { %v120_v9 = vpop.f32.mrf.mxu0 }
  0xea   :  { %v121_v10 = vadd.f32 %v273_v4, %v120_v9  ;;  %132 = vadd.xlane.f32.xlu1 %v130_v8 }
  0xeb   :  { %v306_v11 = vpop.f32.mrf.mxu0 }
  0xec   :  { %126 = vadd.xlane.f32.xlu0 %v121_v10  ;;  %v131_v12 = vmul.f32 %v121_v10, %v121_v10 }
  0xee   :  { %134 = vadd.xlane.f32.xlu1 %v131_v12 }
 0x171   :  { %v125_v21 = vpop.xlane.xlu0 %124 }
 0x172   :  { %v128_v22 = vmul.f32 0.015625, %v125_v21 }
 0x173   :  { %v133_v23 = vpop.xlane.xlu1 %132 }
 0x174   :  { %v138_v24 = vmul.f32 %v128_v22, %v128_v22  ;;  %v136_v25 = vmul.f32 0.015625, %v133_v23  ;;  %v144_v38 = vsub.f32 %v118_v6, %v128_v22 }
 0x175   :  { %v127_v26 = vpop.xlane.xlu0 %126 }
 0x176   :  { %v140_v27 = vsub.f32 %v136_v25, %v138_v24  ;;  %v129_v28 = vmul.f32 0.015625, %v127_v26 }
 0x177   :  { %v135_v29 = vpop.xlane.xlu1 %134 }
 0x178   :  { %v142_v30 = vmax.f32 %v140_v27, 0.0  ;;  %v139_v31 = vmul.f32 %v129_v28, %v129_v28  ;;  %v137_v32 = vmul.f32 0.015625, %v135_v29  ;;  %v145_v39 = vsub.f32 %v121_v10, %v129_v28 }
 0x17a   :  { %v146_v33 = vadd.f32 1e-05, %v142_v30  ;;  %v141_v34 = vsub.f32 %v137_v32, %v139_v31 }
 0x17c   :  { %v143_v35 = vmax.f32 %v141_v34, 0.0  ;;  %344 = vrsqrt.f32 %v146_v33 }
 0x17e   :  { %v147_v36 = vadd.f32 1e-05, %v143_v35 }
 0x180   :  { %346 = vrsqrt.f32 %v147_v36 }
 0x189   :  { %v345_v37 = vpop.eup %344 }
 0x18a   :  { %v150_v41 = vmul.f32 %v345_v37, %v144_v38 }
 0x18d   :  { %v347_v40 = vpop.eup %346 }
 0x18e   :  { %v151_v42 = vmul.f32 %v347_v40, %v145_v39 }
 0x190   :  { %v152_v43 = vpack.c.bf16 %v151_v42, %v150_v41 }
 0x192   :  { %324 = vmatmul.mubr.bf16.vlgmr.msra.gmra.mxu1 %v152_v43 }
 0x252   :  { %v258_v45 = vpop.f32.mrf.mxu1 }
 0x253   :  { %v259_v46 = vadd.f32 %v278_v44, %v258_v45 }
 0x254   :  { %v325_v47 = vpop.f32.mrf.mxu1 }
 0x255   :  { %265 = vst [vmem:[%s454_s5] sm:$0xff] %v259_v46 }
 0x256   :  { %v261_v48 = vpop.f32.mrf.mxu1 }
 0x257   :  { %v262_v49 = vadd.f32 %v278_v44, %v261_v48 }
 0x258   :  { %v326_v50 = vpop.f32.mrf.mxu1 }
 0x259   :  { %266 = vst [vmem:[%s454_s5 + $0x8] sm:$0xff] %v262_v49 }
 0x25a   :  { %271 = vsyncpa [#allocation3], 1 }
 0x25b   :  { %272 = vsyncpa [#allocation5], 1 }

</bundles_post_ra>
